<compile_context>
chip_gen: v5e
topology: v5e:2x2
jax: 0.10.0
libtpu: 0.0.40
codegen_flags: <defaults>
</compile_context>

<pallas_src>
import jax
import jax.numpy as jnp
from jax.experimental import pallas as pl
from jax.experimental.pallas import tpu as pltpu


_VMEM_LIMIT_BYTES = 32 << 20  # explicit: above v5e's 16 MiB scoped default,
                              # comfortably under v7x's 64 MiB physical VMEM.


def _bypass_kernel(c_ref, x_ref, y_ref, o_ref):
    # c_ref broadcasts over the row axis; arithmetic in f32, single cast on store.
    x = x_ref[...].astype(jnp.float32)
    y = y_ref[...].astype(jnp.float32)
    c = c_ref[...].astype(jnp.float32)
    o_ref[...] = ((1.0 - c) * x + c * y).astype(o_ref.dtype)


def _round_up(n, m):
    return (n + m - 1) // m * m


def _pick_time_tile(rows, lanes, itemsize, target_bytes=3 << 20, max_rows=8192):
    """Largest row tile (multiple of 8) with tile bytes <= target_bytes."""
    tt = target_bytes // max(1, lanes * itemsize)
    tt = min(int(tt), max_rows)
    tt = max(8, (tt // 8) * 8)
    tt = min(tt, _round_up(rows, 8))   # no need to exceed the row count
    return int(tt)


def _cost(rows, lanes, itemsize):
    return pl.CostEstimate(flops=3 * rows * lanes,
                           transcendentals=0,
                           bytes_accessed=3 * rows * lanes * itemsize)


def _blend_2d(c2, x2, y2, out_dtype):
    """c2: (1, lanes) f32; x2 / y2: (R, lanes). Flat row grid, no batch dim."""
    R, lanes = x2.shape
    itemsize = jnp.dtype(out_dtype).itemsize
    tt = _pick_time_tile(R, lanes, itemsize)
    nt = pl.cdiv(R, tt)
    return pl.pallas_call(
        _bypass_kernel,
        out_shape=jax.ShapeDtypeStruct((R, lanes), out_dtype),
        grid_spec=pltpu.PrefetchScalarGridSpec(
            num_scalar_prefetch=0,
            grid=(nt,),
            in_specs=[
                pl.BlockSpec((1, lanes), lambda t: (0, 0)),    # c (resident)
                pl.BlockSpec((tt, lanes), lambda t: (t, 0)),   # x
                pl.BlockSpec((tt, lanes), lambda t: (t, 0)),   # y
            ],
            out_specs=pl.BlockSpec((tt, lanes), lambda t: (t, 0)),
        ),
        compiler_params=pltpu.CompilerParams(
            dimension_semantics=("parallel",),
            vmem_limit_bytes=_VMEM_LIMIT_BYTES),
        cost_estimate=_cost(R, lanes, itemsize),
    )(c2, x2, y2)


def _blend_3d(c3, x3, y3, out_rows, out_dtype):
    """c3: (1, 1, lanes) f32; x3: (B, Rx, lanes), y3: (B, Ry, lanes) with
    Rx, Ry >= out_rows.  Blends the first out_rows rows of each batch; no
    wrapper-side slice (boundary blocks are clipped by Pallas)."""
    B, _, lanes = x3.shape
    itemsize = jnp.dtype(out_dtype).itemsize
    tt = _pick_time_tile(out_rows, lanes, itemsize)
    nt = pl.cdiv(out_rows, tt)
    return pl.pallas_call(
        _bypass_kernel,
        out_shape=jax.ShapeDtypeStruct((B, out_rows, lanes), out_dtype),
        grid_spec=pltpu.PrefetchScalarGridSpec(
            num_scalar_prefetch=0,
            grid=(B, nt),
            in_specs=[
                pl.BlockSpec((1, 1, lanes), lambda b, t: (0, 0, 0)),   # c
                pl.BlockSpec((1, tt, lanes), lambda b, t: (b, t, 0)),  # x
                pl.BlockSpec((1, tt, lanes), lambda b, t: (b, t, 0)),  # y
            ],
            out_specs=pl.BlockSpec((1, tt, lanes), lambda b, t: (b, t, 0)),
        ),
        compiler_params=pltpu.CompilerParams(
            dimension_semantics=("parallel", "parallel"),
            vmem_limit_bytes=_VMEM_LIMIT_BYTES),
        cost_estimate=_cost(B * out_rows, lanes, itemsize),
    )(c3, x3, y3)


def bypass(x, y, c):
    """x: (B, Tx, D), y: (B, Ty, D), c: (D,).  Returns (B, min(Tx, Ty), D)."""
    assert x.ndim == 3 and y.ndim == 3
    B, Tx, D = x.shape
    _, Ty, Dy = y.shape
    assert Dy == D and c.shape == (D,)
    L = min(Tx, Ty)

    out_dtype = jnp.result_type(x.dtype, y.dtype)
    # Hoist the clamp out of the kernel; keep c in f32 (tiny, VMEM-resident).
    c_f32 = jnp.clip(c.astype(jnp.float32), 0.0, 1.0)

    if D % 128 == 0:
        if Tx == Ty:
            # Contiguous (free) flatten: one ragged boundary total, fine-grained
            # 1-D grid that splits evenly across v7x's two TensorCores.
            out = _blend_2d(c_f32.reshape(1, D),
                            x.reshape(B * L, D), y.reshape(B * L, D), out_dtype)
            return out.reshape(B, L, D)
        # Mismatched time lengths: no wrapper slice (that would be a full HBM
        # read+write of both inputs); the grid only visits the first L rows.
        return _blend_3d(c_f32.reshape(1, 1, D), x, y, L, out_dtype)

    if 128 % D == 0 and (L * D) % 128 == 0:
        # Small channel dim: pack channels into a dense 128-lane last axis so
        # stores are unmasked.  c repeats every D lanes.
        rows = (L * D) // 128
        c128 = jnp.tile(c_f32, 128 // D)
        if (Tx * D) % 128 == 0 and (Ty * D) % 128 == 0:
            # Full-array reshape is contiguous -> free, no slice copy.
            x3 = x.reshape(B, (Tx * D) // 128, 128)
            y3 = y.reshape(B, (Ty * D) // 128, 128)
        else:
            # TODO(synk): this slice materializes a copy of x/y before the
            # pallas_call; only hit when Tx*D / Ty*D are not 128-aligned.
            x3 = x[:, :L, :].reshape(B, rows, 128)
            y3 = y[:, :L, :].reshape(B, rows, 128)
        if x3.shape[1] == rows and y3.shape[1] == rows:
            out = _blend_2d(c128.reshape(1, 128),
                            x3.reshape(B * rows, 128),
                            y3.reshape(B * rows, 128), out_dtype)
        else:
            out = _blend_3d(c128.reshape(1, 1, 128), x3, y3, rows, out_dtype)
        return out.reshape(B, L, D)

    # Odd channel count: pad D up to the next multiple of 128 so the output
    # stays lane-dense (no masked vst.msk partial stores).
    # TODO(synk): the pad materializes a copy of x/y; acceptable on this rare path.
    Dp = _round_up(D, 128)
    xs = jnp.pad(x[:, :L, :], ((0, 0), (0, 0), (0, Dp - D)))
    ys = jnp.pad(y[:, :L, :], ((0, 0), (0, 0), (0, Dp - D)))
    cp = jnp.pad(c_f32, (0, Dp - D))
    out = _blend_2d(cp.reshape(1, Dp),
                    xs.reshape(B * L, Dp), ys.reshape(B * L, Dp), out_dtype)
    return out.reshape(B, L, Dp)[:, :, :D]


def _reference(x, y, c):
    L = min(x.shape[1], y.shape[1])
    cc = jnp.clip(c.astype(jnp.float32), 0.0, 1.0)
    xf = x[:, :L, :].astype(jnp.float32)
    yf = y[:, :L, :].astype(jnp.float32)
    return (1.0 - cc) * xf + cc * yf


if __name__ == "__main__":
    key = jax.random.PRNGKey(0)
    keys = jax.random.split(key, 12)

    # Case 1: small channel dim (lane-packing path), mismatched time lengths.
    B, Tx, Ty, D = 2, 8, 10, 32
    x = jax.random.normal(keys[0], (B, Tx, D), dtype=jnp.float32)
    y = jax.random.normal(keys[1], (B, Ty, D), dtype=jnp.float32)
    c = 0.9 + 0.1 * jax.random.uniform(keys[2], (D,), dtype=jnp.float32)
    out = bypass(x, y, c)
    jax.block_until_ready(out)
    ref = _reference(x, y, c)
    assert out.shape == (B, min(Tx, Ty), D)
    assert jnp.allclose(out, ref, rtol=1e-5, atol=1e-5), "mismatch (D=32)"

    # Case 2: production-like channel dim, ragged time boundary (3-D clipped path).
    B2, Tx2, Ty2, D2 = 2, 9, 12, 256
    x2 = jax.random.normal(keys[3], (B2, Tx2, D2), dtype=jnp.float32)
    y2 = jax.random.normal(keys[4], (B2, Ty2, D2), dtype=jnp.float32)
    c2 = 0.9 + 0.1 * jax.random.uniform(keys[5], (D2,), dtype=jnp.float32)
    out2 = bypass(x2, y2, c2)
    jax.block_until_ready(out2)
    ref2 = _reference(x2, y2, c2)
    assert out2.shape == (B2, min(Tx2, Ty2), D2)
    assert jnp.allclose(out2, ref2, rtol=1e-5, atol=1e-5), "mismatch (D=256)"

    # Case 3: equal time lengths, bf16 inputs -> flattened 1-D grid path,
    # f32 internal blend, exact pass-through semantics at clamp endpoints.
    B3, T3, D3 = 2, 16, 128
    x3 = jax.random.normal(keys[6], (B3, T3, D3), dtype=jnp.float32).astype(jnp.bfloat16)
    y3 = jax.random.normal(keys[7], (B3, T3, D3), dtype=jnp.float32).astype(jnp.bfloat16)
    c3 = 0.9 + 0.2 * jax.random.uniform(keys[8], (D3,), dtype=jnp.float32)  # some values clamp to 1
    out3 = bypass(x3, y3, c3)
    jax.block_until_ready(out3)
    ref3 = _reference(x3, y3, c3)
    assert out3.shape == (B3, T3, D3) and out3.dtype == jnp.bfloat16
    assert jnp.allclose(out3.astype(jnp.float32), ref3, rtol=1e-2, atol=1e-2), "mismatch (bf16)"

    # Case 4: odd channel count -> lane-padded fallback path.
    B4, Tx4, Ty4, D4 = 1, 8, 8, 48
    x4 = jax.random.normal(keys[9], (B4, Tx4, D4), dtype=jnp.float32)
    y4 = jax.random.normal(keys[10], (B4, Ty4, D4), dtype=jnp.float32)
    c4 = 0.9 + 0.1 * jax.random.uniform(keys[11], (D4,), dtype=jnp.float32)
    out4 = bypass(x4, y4, c4)
    jax.block_until_ready(out4)
    ref4 = _reference(x4, y4, c4)
    assert out4.shape == (B4, 8, D4)
    assert jnp.allclose(out4, ref4, rtol=1e-5, atol=1e-5), "mismatch (D=48)"

    print("KERNEL_OK")
</pallas_src>

<mosaic_0001>
module attributes {stable_mosaic.version = 11 : i64} {
  func.func @_bypass_kernel(%arg0: i32, %arg1: memref<1x128xf32, #tpu.memory_space<vmem>>, %arg2: memref<8x128xf32, #tpu.memory_space<vmem>>, %arg3: memref<8x128xf32, #tpu.memory_space<vmem>>, %arg4: memref<8x128xf32, #tpu.memory_space<vmem>>) attributes {dimension_semantics = [#tpu.dimension_semantics<parallel>], iteration_bounds = array<i64: 1>, scalar_prefetch = 0 : i64, scratch_operands = 0 : i64, tpu.core_type = #tpu.core_type<tc>, window_params = [{pipeline_mode = #tpu.pipeline_mode<synchronous>, transform_indices = @transform_0, window_bounds = array<i64: 1, 128>}, {transform_indices = @transform_1, window_bounds = array<i64: 8, 128>}, {transform_indices = @transform_2, window_bounds = array<i64: 8, 128>}, {transform_indices = @transform_3, window_bounds = array<i64: 8, 128>}]} {
    %c0 = arith.constant 0 : index
    %c0_0 = arith.constant 0 : index
    %0 = vector.load %arg2[%c0, %c0_0] : memref<8x128xf32, #tpu.memory_space<vmem>>, vector<8x128xf32>
    %c0_1 = arith.constant 0 : index
    %c0_2 = arith.constant 0 : index
    %1 = vector.load %arg3[%c0_1, %c0_2] : memref<8x128xf32, #tpu.memory_space<vmem>>, vector<8x128xf32>
    %c0_3 = arith.constant 0 : index
    %c0_4 = arith.constant 0 : index
    %2 = vector.load %arg1[%c0_3, %c0_4] : memref<1x128xf32, #tpu.memory_space<vmem>>, vector<1x128xf32>
    %cst = arith.constant 1.000000e+00 : f32
    %3 = vector.broadcast %cst : f32 to vector<1x128xf32>
    %4 = arith.subf %3, %2 : vector<1x128xf32>
    %5 = vector.broadcast %4 : vector<1x128xf32> to vector<8x128xf32>
    %6 = arith.mulf %5, %0 : vector<8x128xf32>
    %7 = vector.broadcast %2 : vector<1x128xf32> to vector<8x128xf32>
    %8 = arith.mulf %7, %1 : vector<8x128xf32>
    %9 = arith.addf %6, %8 : vector<8x128xf32>
    %c0_5 = arith.constant 0 : index
    %c0_6 = arith.constant 0 : index
    %10 = vector.load %arg4[%c0_5, %c0_6] : memref<8x128xf32, #tpu.memory_space<vmem>>, vector<8x128xf32>
    tpu.vector_store %arg4[%c0_5, %c0_6], %9 {strides = array<i32>} : memref<8x128xf32, #tpu.memory_space<vmem>>, vector<8x128xf32>,
    return
  }
  func.func @transform_0(%arg0: i32) -> (i32, i32) {
    %c0_i32 = arith.constant 0 : i32
    %c0_i32_0 = arith.constant 0 : i32
    %c0_i32_1 = arith.constant 0 : i32
    return %c0_i32, %c0_i32_0 : i32, i32
  }
  func.func @transform_1(%arg0: i32) -> (i32, i32) {
    %c0_i32 = arith.constant 0 : i32
    %c0_i32_0 = arith.constant 0 : i32
    return %arg0, %c0_i32 : i32, i32
  }
  func.func @transform_2(%arg0: i32) -> (i32, i32) {
    %c0_i32 = arith.constant 0 : i32
    %c0_i32_0 = arith.constant 0 : i32
    return %arg0, %c0_i32 : i32, i32
  }
  func.func @transform_3(%arg0: i32) -> (i32, i32) {
    %c0_i32 = arith.constant 0 : i32
    %c0_i32_0 = arith.constant 0 : i32
    return %arg0, %c0_i32 : i32, i32
  }
}

</mosaic_0001>

<bundles_post_ra>
// kernel: tpu_custom_call.1
= control target key start
LH: loop header
LB: loop body
LE: loop exit
PB: predicated region body
PF: predicated region fallthrough
CT: control target
= control target key end

     0   :  { %8 = vsyncpa [#allocation3], 0  ;;  %s250_s0 = inlined_call_operand.hbm [shape: f32[1,128], index: 0, kind: input, shape index: {}]   ;;  %s251_s1 = inlined_call_operand.hbm [shape: f32[4,128], index: 1, kind: input, shape index: {}]   ;;  %s252_s2 = inlined_call_operand.hbm [shape: f32[4,128], index: 2, kind: input, shape index: {}]   ;;  %s253_s3 = inlined_call_operand.hbm [shape: f32[4,128], index: 3, kind: output, shape index: {}]  }
   0x1   :  { %9 = vsyncpa [#allocation6], 0 }
   0x2   :  { %10 = vsyncpa [#allocation4], 0  ;;  %s16_s14 = sshll.u32 %s250_s0, 4  ;;  %s203_s15 = smov [#allocation2]   ;;  %s17_s14 = int_to_ptr.hbm [resolvable:$true] %s16_s14 }
   0x3   :  { %s18_s16 = sshll.u32 %s203_s15, 4  ;;  %s19_s16 = int_to_ptr.vmem [resolvable:$true] %s18_s16 }
   0x4   :  { %21 = dma.hbm_to_vmem [thread:$0]  %s17_s14, 16, %s19_s16, [#allocation3]  }
   0x5   :  { %25 = vsyncadd [#allocation6], 64  ;;  %s26_s19 = sshll.u32 %s251_s1, 4  ;;  %s204_s20 = smov [#allocation5]   ;;  %s27_s19 = int_to_ptr.hbm [resolvable:$true] %s26_s19 }
   0x6   :  { %s28_s21 = sshll.u32 %s204_s20, 4  ;;  %s205_s22 = smov 64   ;;  %s29_s21 = int_to_ptr.vmem [resolvable:$true] %s28_s21 }
   0x7   :  { %s206_s23 = smov 4  }
   0x8   :  { %34 = dma.hbm_to_vmem [thread:$0]  %s27_s19, 64, %s29_s21, [#allocation6], %s205_s22, %s205_s22, %s206_s23  }
   0x9   :  { %38 = vsyncadd [#allocation6], 64  ;;  %s39_s25 = sshll.u32 %s252_s2, 4  ;;  %s207_s26 = smov [#allocation7]   ;;  %s40_s25 = int_to_ptr.hbm [resolvable:$true] %s39_s25 }
   0xa   :  { %s41_s27 = sshll.u32 %s207_s26, 4  ;;  %s42_s27 = int_to_ptr.vmem [resolvable:$true] %s41_s27 }
   0xb   :  { %47 = dma.hbm_to_vmem [thread:$0]  %s40_s25, 64, %s42_s27, [#allocation6], %s205_s22, %s205_s22, %s206_s23  }
   0xc   :  { %197 = dma.done.wait [#allocation3], 16  }
   0xd   :  { %198 = vsyncadd [#allocation3], 4294967280 }
   0xe   :  { %199 = dma.done.wait [#allocation6], 256  }
   0xf   :  { %200 = vsyncadd [#allocation6], 4294967040  ;;  %v61_v0 = vld [vmem:[#allocation7] sm:$0xff]  ;;  %v62_v1 = vld [vmem:[#allocation2] sm:$0x1] }
  0x10   :  { %v63_v2 = vsub.f32 1.0, %v62_v1  ;;  %v100_v3 = vld [vmem:[#allocation2] ss:$0 sm:$0xff]  ;;  %v60_v4 = vld [vmem:[#allocation5] sm:$0xff] }
  0x11   :  { %v71_v6 = vmul.f32 %v100_v3, %v61_v0 }
  0x12   :  { %v65_v5 = vperm.slane %v63_v2, 0 }
  0x14   :  { %v67_v7 = vmul.f32 %v65_v5, %v60_v4 }
  0x16   :  { %v72_v8 = vadd.f32 %v71_v6, %v67_v7 }
  0x18   :  { %73 = vst [vmem:[#allocation8] sm:$0xff] %v72_v8 }
  0x19   :  { %77 = vsyncadd [#allocation4], 64  ;;  %s80_s28 = sshll.u32 %s253_s3, 4  ;;  %s208_s29 = smov [#allocation8]   ;;  %s81_s28 = int_to_ptr.hbm [resolvable:$true] %s80_s28 }
  0x1a   :  { %s78_s30 = sshll.u32 %s208_s29, 4  ;;  %s79_s30 = int_to_ptr.vmem [resolvable:$true] %s78_s30 }
  0x1b   :  { %86 = dma.vmem_to_hbm [thread:$0]  %s79_s30, 64, %s81_s28, [#allocation4], %s205_s22, %s205_s22, %s206_s23  }
  0x1c   :  { %201 = dma.done.wait [#allocation4], 128  }
  0x1d   :  { %202 = vsyncadd [#allocation4], 4294967168 }
  0x1e   :  { %91 = vsyncpa [#allocation3], 1 }
  0x1f   :  { %92 = vsyncpa [#allocation6], 1 }
  0x20   :  { %93 = vsyncpa [#allocation4], 1 }

</bundles_post_ra>
